<compile_context>
chip_gen: v7x
topology: tpu7x:2x2x1
jax: 0.10.0
libtpu: 0.0.40
codegen_flags: <defaults>
</compile_context>

<pallas_src>
import functools

import jax
import jax.numpy as jnp
from jax.experimental import pallas as pl
from jax.experimental.pallas import tpu as pltpu

_EPSILON = 1e-6
_VMEM_LIMIT_BYTES = 48 * 1024 * 1024          # fits v5e/v6e (128 MiB) and v7x (64 MiB)
_TARGET_BLOCK_F32_BYTES = 2 * 1024 * 1024     # padded-f32 working block per input


def _round_up(x, m):
    return ((x + m - 1) // m) * m


def _focal_elementwise(preds, targets, *, class_axis, gamma, has_softmax,
                       fuse_log_softmax):
    """Per-element focal-loss terms for one f32 block."""
    if has_softmax:
        m = jnp.max(preds, axis=class_axis, keepdims=True)
        shifted = preds - m
        e = jnp.exp(shifted)
        s = jnp.sum(e, axis=class_axis, keepdims=True)
        # One reciprocal per row instead of a per-element divide.
        p = e * pl.reciprocal(s, approx=False)
        if fuse_log_softmax:
            # log p = (x - m) - log(sum); 1 EUP transcendental/elem (opt-in,
            # drops the +1e-6 which only matters when p ~ 0 AND target > 0).
            log_p = shifted - jnp.log(s)
        else:
            log_p = jnp.log(p + _EPSILON)
    else:
        p = preds
        log_p = jnp.log(p + _EPSILON)

    loss = -targets * log_p

    g = float(gamma)
    if g.is_integer():
        mod = (1.0 - p) ** int(g)                    # plain VPU multiplies
    elif (2.0 * g).is_integer():
        mod = jnp.sqrt(1.0 - p) ** int(2.0 * g)      # avoids exp+log of jnp.power
    else:
        mod = jnp.power(1.0 - p, jnp.float32(g))
    return loss * mod


# --------------------------- 2-D (N, Classes) path ---------------------------

def _focal_loss_2d_kernel(preds_ref, targets_ref, out_ref, *, gamma, has_softmax,
                          fuse_log_softmax, targets_are_labels, n_total, tile_n):
    preds = preds_ref[...].astype(jnp.float32)                  # (tile_n, C)

    if targets_are_labels:
        labels = targets_ref[...]                               # (tile_n, 1) int32
        class_ids = jax.lax.broadcasted_iota(jnp.int32, preds.shape, 1)
        targets = (class_ids == labels).astype(jnp.float32)     # in-kernel one-hot
    else:
        targets = targets_ref[...].astype(jnp.float32)

    loss = _focal_elementwise(preds, targets, class_axis=-1, gamma=gamma,
                              has_softmax=has_softmax,
                              fuse_log_softmax=fuse_log_softmax)

    if n_total % tile_n != 0:
        # Mask stale rows of the partial last block BEFORE the axis-0 reduce.
        row = jax.lax.broadcasted_iota(jnp.int32, (loss.shape[0], 1), 0)
        valid = (pl.program_id(0) * tile_n + row) < n_total
        loss = jnp.where(valid, loss, 0.0)

    # Per-class partial sum for this tile (cheap sublane reduce only); weight,
    # cross-lane reduce and the /N mean are finished once in the wrapper.
    out_ref[...] = jnp.sum(loss, axis=0, keepdims=True)[None]   # (1, 1, C)


def _focal_loss_2d(preds, targets, *, gamma, weight, has_softmax,
                   fuse_log_softmax, tile_n):
    n, c = preds.shape
    targets_are_labels = (targets.ndim == 1)
    if targets_are_labels:
        assert targets.shape == (n,)
        targets_in = targets.astype(jnp.int32).reshape(n, 1)
        tgt_itemsize = 4
        tgt_block = None  # set below
    else:
        assert targets.shape == (n, c)
        targets_in = targets
        tgt_itemsize = jnp.dtype(targets.dtype).itemsize

    # Per-class weight (scalar or vector) applied once, outside the kernel.
    if weight is None:
        weight2d = jnp.ones((1, c), dtype=jnp.float32)
    else:
        w = jnp.asarray(weight, dtype=jnp.float32)
        weight2d = jnp.broadcast_to(w.reshape(1, -1), (1, c))

    itemsize = jnp.dtype(preds.dtype).itemsize
    sublane = 16 if itemsize < 4 else 8               # bf16 packs 16 rows / vreg
    lane_c = _round_up(c, 128)                        # lane padding after f32 cast

    if tile_n is None:
        # Size against the *padded f32* footprint (tile_n * round_up(C,128) * 4),
        # not tile_n*C*itemsize: with 2 inputs x 2 pipeline buffers plus a few f32
        # temporaries this stays well inside the 48 MiB limit requested below.
        tile_n = (_TARGET_BLOCK_F32_BYTES // (lane_c * 4)) // sublane * sublane
    tile_n = int(min(max(tile_n, sublane), _round_up(n, sublane)))
    tile_n = max(sublane, (tile_n // sublane) * sublane)
    num_tiles = pl.cdiv(n, tile_n)

    cost = pl.CostEstimate(
        flops=int(10 * n * c),
        transcendentals=int(2 * n * c),
        bytes_accessed=int(n * c * itemsize
                           + n * (1 if targets_are_labels else c) * tgt_itemsize
                           + num_tiles * c * 4),
    )

    kernel = functools.partial(
        _focal_loss_2d_kernel, gamma=float(gamma), has_softmax=bool(has_softmax),
        fuse_log_softmax=bool(fuse_log_softmax),
        targets_are_labels=targets_are_labels, n_total=n, tile_n=tile_n)

    tgt_block = (tile_n, 1) if targets_are_labels else (tile_n, c)

    per_tile_per_class = pl.pallas_call(
        kernel,
        out_shape=jax.ShapeDtypeStruct((num_tiles, 1, c), jnp.float32),
        grid_spec=pltpu.PrefetchScalarGridSpec(
            num_scalar_prefetch=0,
            grid=(num_tiles,),
            in_specs=[
                pl.BlockSpec((tile_n, c), lambda i: (i, 0)),   # preds tile
                pl.BlockSpec(tgt_block, lambda i: (i, 0)),     # targets / labels tile
            ],
            out_specs=pl.BlockSpec((1, 1, c), lambda i: (i, 0, 0)),
        ),
        compiler_params=pltpu.CompilerParams(
            dimension_semantics=("parallel",),        # no carried accumulator
            vmem_limit_bytes=_VMEM_LIMIT_BYTES,
        ),
        cost_estimate=cost,
    )(preds, targets_in)

    per_class = per_tile_per_class[:, 0, :]           # (num_tiles, C)
    total = jnp.sum(per_class * weight2d)             # weight applied once, outside
    return total / jnp.float32(n)                     # sum(1).mean()


# ----------------------------- 3-D (N, C, L) path ----------------------------

def _focal_loss_3d_kernel(preds_ref, targets_ref, out_ref, *, gamma, has_softmax,
                          fuse_log_softmax, l_total, tile_l):
    preds = preds_ref[...].astype(jnp.float32)                  # (C, tile_l)
    targets = targets_ref[...].astype(jnp.float32)

    loss = _focal_elementwise(preds, targets, class_axis=0, gamma=gamma,
                              has_softmax=has_softmax,
                              fuse_log_softmax=fuse_log_softmax)

    if l_total % tile_l != 0:
        lane = jax.lax.broadcasted_iota(jnp.int32, (1, loss.shape[1]), 1)
        valid = (pl.program_id(1) * tile_l + lane) < l_total
        loss = jnp.where(valid, loss, 0.0)

    out_ref[...] = jnp.sum(loss, axis=0, keepdims=True)[None]   # (1, 1, tile_l)


def _focal_loss_3d(preds, targets, *, gamma, weight, has_softmax,
                   fuse_log_softmax, tile_l):
    assert preds.shape == targets.shape
    n, c, l = preds.shape

    itemsize = jnp.dtype(preds.dtype).itemsize
    sub_c = _round_up(c, 8)                            # class axis on sublanes

    if tile_l is None:
        tile_l = (_TARGET_BLOCK_F32_BYTES // (sub_c * 4)) // 128 * 128
    if l <= 128:
        tile_l = l                                     # full-dim block is always legal
    else:
        tile_l = int(min(max(tile_l, 128), _round_up(l, 128)))
        tile_l = max(128, (tile_l // 128) * 128)
    num_l_tiles = pl.cdiv(l, tile_l)

    cost = pl.CostEstimate(
        flops=int(10 * n * c * l),
        transcendentals=int(2 * n * c * l),
        bytes_accessed=int(2 * n * c * l * itemsize + n * l * 4),
    )

    kernel = functools.partial(
        _focal_loss_3d_kernel, gamma=float(gamma), has_softmax=bool(has_softmax),
        fuse_log_softmax=bool(fuse_log_softmax), l_total=l, tile_l=tile_l)

    per_pos = pl.pallas_call(
        kernel,
        out_shape=jax.ShapeDtypeStruct((n, 1, l), jnp.float32),
        grid_spec=pltpu.PrefetchScalarGridSpec(
            num_scalar_prefetch=0,
            grid=(n, num_l_tiles),
            in_specs=[
                pl.BlockSpec((None, c, tile_l), lambda i, j: (i, 0, j)),
                pl.BlockSpec((None, c, tile_l), lambda i, j: (i, 0, j)),
            ],
            out_specs=pl.BlockSpec((1, 1, tile_l), lambda i, j: (i, 0, j)),
        ),
        compiler_params=pltpu.CompilerParams(
            dimension_semantics=("parallel", "parallel"),
            vmem_limit_bytes=_VMEM_LIMIT_BYTES,
        ),
        cost_estimate=cost,
    )(preds, targets)[:, 0, :]                         # (N, L) per-position class sums

    # PyTorch: `loss *= weight` on an (N, C, L) tensor broadcasts `weight` against
    # the trailing L axis (scalar or length-L vector); the factor commutes with the
    # class sum, so it is applied here, after the kernel.
    # TODO(synk): a length-C weight with C != L raises, exactly as in PyTorch.
    if weight is not None:
        per_pos = per_pos * jnp.asarray(weight, dtype=jnp.float32)
    return jnp.sum(per_pos) / jnp.float32(n * l)       # sum(1).mean()


# ---------------------------------- wrapper ----------------------------------

def focal_loss(preds, targets, *, gamma=2.0, weight=None, has_softmax=True,
               fuse_log_softmax=False, tile_n=None, tile_l=None):
    """Pallas implementation of FocalLoss.forward.

    preds:   (N, C) or (N, C, L) logits (probabilities if has_softmax=False).
    targets: same shape as preds, or -- 2-D fast path -- an (N,) integer label
             vector (one-hot built in-kernel, halving HBM read traffic).
    """
    if preds.ndim == 3:
        return _focal_loss_3d(preds, targets, gamma=gamma, weight=weight,
                              has_softmax=has_softmax,
                              fuse_log_softmax=fuse_log_softmax, tile_l=tile_l)
    assert preds.ndim == 2
    return _focal_loss_2d(preds, targets, gamma=gamma, weight=weight,
                          has_softmax=has_softmax,
                          fuse_log_softmax=fuse_log_softmax, tile_n=tile_n)


if __name__ == "__main__":
    key = jax.random.PRNGKey(0)
    k1, k2, k3, k4 = jax.random.split(key, 4)

    gamma = 2.0

    # ---- 2-D (N, Classes) path ---------------------------------------------
    N, C = 10, 32                         # N deliberately NOT a multiple of the tile
    logits = jax.random.normal(k1, (N, C), dtype=jnp.float32)
    labels = jax.random.randint(k2, (N,), 0, C)
    targets = jax.nn.one_hot(labels, C, dtype=jnp.float32)
    weight = jnp.linspace(0.5, 1.5, C, dtype=jnp.float32)

    p = jax.nn.softmax(logits, axis=-1)
    ref2d = jnp.mean(jnp.sum(-targets * jnp.log(p + _EPSILON)
                             * (1.0 - p) ** gamma * weight[None, :], axis=1))

    out_dense = jax.block_until_ready(
        focal_loss(logits, targets, gamma=gamma, weight=weight))
    assert jnp.allclose(out_dense, ref2d, rtol=1e-5, atol=1e-6), (out_dense, ref2d)

    # integer-label fast path (one-hot built in-kernel, half the HBM reads)
    out_labels = jax.block_until_ready(
        focal_loss(logits, labels, gamma=gamma, weight=weight))
    assert jnp.allclose(out_labels, ref2d, rtol=1e-5, atol=1e-6), (out_labels, ref2d)

    # opt-in fused log-softmax (drops the +1e-6 inside the log -> looser tolerance)
    out_fused = jax.block_until_ready(
        focal_loss(logits, targets, gamma=gamma, weight=weight,
                   fuse_log_softmax=True))
    assert jnp.allclose(out_fused, ref2d, rtol=2e-3, atol=1e-4), (out_fused, ref2d)

    # ---- 3-D (N, C, L) path --------------------------------------------------
    N3, C3, L3 = 2, 4, 20
    logits3 = jax.random.normal(k3, (N3, C3, L3), dtype=jnp.float32)
    labels3 = jax.random.randint(k4, (N3, L3), 0, C3)
    targets3 = jnp.transpose(jax.nn.one_hot(labels3, C3, dtype=jnp.float32),
                             (0, 2, 1))                 # (N, C, L)

    p3 = jax.nn.softmax(logits3, axis=1)
    ref3d = jnp.mean(jnp.sum(-targets3 * jnp.log(p3 + _EPSILON)
                             * (1.0 - p3) ** gamma, axis=1))

    out3d = jax.block_until_ready(
        focal_loss(logits3, targets3, gamma=gamma, weight=None))
    assert jnp.allclose(out3d, ref3d, rtol=1e-5, atol=1e-6), (out3d, ref3d)

    print("KERNEL_OK")
</pallas_src>

<mosaic_0001>
module attributes {stable_mosaic.version = 11 : i64} {
  func.func @_focal_loss_2d_kernel(%arg0: i32, %arg1: memref<16x32xf32, #tpu.memory_space<vmem>>, %arg2: memref<16x32xf32, #tpu.memory_space<vmem>>, %arg3: memref<1x1x32xf32, #tpu.memory_space<vmem>>) attributes {dimension_semantics = [#tpu.dimension_semantics<parallel>], iteration_bounds = array<i64: 1>, scalar_prefetch = 0 : i64, scratch_operands = 0 : i64, tpu.core_type = #tpu.core_type<tc>, window_params = [{transform_indices = @transform_0, window_bounds = array<i64: 16, 32>}, {transform_indices = @transform_1, window_bounds = array<i64: 16, 32>}, {transform_indices = @transform_2, window_bounds = array<i64: 1, 1, 32>}]} {
    %c0 = arith.constant 0 : index
    %c0_0 = arith.constant 0 : index
    %0 = vector.load %arg1[%c0, %c0_0] : memref<16x32xf32, #tpu.memory_space<vmem>>, vector<16x32xf32>
    %c0_1 = arith.constant 0 : index
    %c0_2 = arith.constant 0 : index
    %1 = vector.load %arg2[%c0_1, %c0_2] : memref<16x32xf32, #tpu.memory_space<vmem>>, vector<16x32xf32>
    %cst = arith.constant dense<0xFF800000> : vector<16xf32>
    %2 = vector.multi_reduction <maximumf>, %0, %cst [1] : vector<16x32xf32> to vector<16xf32>
    %3 = vector.shape_cast %2 : vector<16xf32> to vector<16x1xf32>
    %4 = vector.broadcast %3 : vector<16x1xf32> to vector<16x32xf32>
    %5 = arith.subf %0, %4 : vector<16x32xf32>
    %6 = math.exp %5 : vector<16x32xf32>
    %cst_3 = arith.constant dense<0.000000e+00> : vector<16xf32>
    %7 = vector.multi_reduction <add>, %6, %cst_3 [1] : vector<16x32xf32> to vector<16xf32>
    %8 = vector.shape_cast %7 : vector<16xf32> to vector<16x1xf32>
    %9 = tpu.reciprocal %8 : vector<16x1xf32> -> vector<16x1xf32>
    %10 = vector.broadcast %9 : vector<16x1xf32> to vector<16x32xf32>
    %11 = arith.mulf %6, %10 : vector<16x32xf32>
    %cst_4 = arith.constant 9.99999997E-7 : f32
    %12 = vector.broadcast %cst_4 : f32 to vector<16x32xf32>
    %13 = arith.addf %11, %12 : vector<16x32xf32>
    %14 = math.log %13 : vector<16x32xf32>
    %cst_5 = arith.constant 0.000000e+00 : f32
    %15 = vector.broadcast %cst_5 : f32 to vector<16x32xf32>
    %16 = arith.subf %15, %1 : vector<16x32xf32>
    %17 = arith.mulf %16, %14 : vector<16x32xf32>
    %cst_6 = arith.constant 1.000000e+00 : f32
    %18 = vector.broadcast %cst_6 : f32 to vector<16x32xf32>
    %19 = arith.subf %18, %11 : vector<16x32xf32>
    %20 = arith.mulf %19, %19 : vector<16x32xf32>
    %21 = arith.mulf %17, %20 : vector<16x32xf32>
    %22 = tpu.iota {dimensions = array<i32: 0>} : vector<16x1xi32>
    %c16_i32 = arith.constant 16 : i32
    %23 = arith.muli %arg0, %c16_i32 : i32
    %24 = vector.broadcast %23 : i32 to vector<16x1xi32>
    %25 = arith.addi %24, %22 : vector<16x1xi32>
    %c10_i32 = arith.constant 10 : i32
    %26 = vector.broadcast %c10_i32 : i32 to vector<16x1xi32>
    %27 = arith.cmpi slt, %25, %26 : vector<16x1xi32>
    %cst_7 = arith.constant 0.000000e+00 : f32
    %28 = vector.shape_cast %27 : vector<16x1xi1> to vector<16x1xi1>
    %29 = vector.broadcast %28 : vector<16x1xi1> to vector<16x32xi1>
    %30 = vector.broadcast %cst_7 : f32 to vector<16x32xf32>
    %31 = arith.select %29, %21, %30 : vector<16x32xi1>, vector<16x32xf32>
    %cst_8 = arith.constant dense<0.000000e+00> : vector<32xf32>
    %32 = vector.multi_reduction <add>, %31, %cst_8 [0] : vector<16x32xf32> to vector<32xf32>
    %33 = vector.shape_cast %32 : vector<32xf32> to vector<1x32xf32>
    %34 = vector.shape_cast %33 : vector<1x32xf32> to vector<1x1x32xf32>
    %c0_9 = arith.constant 0 : index
    %c0_10 = arith.constant 0 : index
    %c0_11 = arith.constant 0 : index
    %35 = vector.load %arg3[%c0_9, %c0_10, %c0_11] : memref<1x1x32xf32, #tpu.memory_space<vmem>>, vector<1x1x32xf32>
    tpu.vector_store %arg3[%c0_9, %c0_10, %c0_11], %34 {strides = array<i32>} : memref<1x1x32xf32, #tpu.memory_space<vmem>>, vector<1x1x32xf32>,
    return
  }
  func.func @transform_0(%arg0: i32) -> (i32, i32) {
    %c0_i32 = arith.constant 0 : i32
    %c0_i32_0 = arith.constant 0 : i32
    return %arg0, %c0_i32 : i32, i32
  }
  func.func @transform_1(%arg0: i32) -> (i32, i32) {
    %c0_i32 = arith.constant 0 : i32
    %c0_i32_0 = arith.constant 0 : i32
    return %arg0, %c0_i32 : i32, i32
  }
  func.func @transform_2(%arg0: i32) -> (i32, i32, i32) {
    %c0_i32 = arith.constant 0 : i32
    %c0_i32_0 = arith.constant 0 : i32
    %c0_i32_1 = arith.constant 0 : i32
    return %arg0, %c0_i32, %c0_i32_0 : i32, i32, i32
  }
}

</mosaic_0001>

<bundles_post_ra>
// kernel: tpu_custom_call.1
= control target key start
LH: loop header
LB: loop body
LE: loop exit
PB: predicated region body
PF: predicated region fallthrough
CT: control target
= control target key end

     0   :  { %7 = vsyncpa [#allocation3], 0  ;;  %s276_s0 = inlined_call_operand.hbm [shape: f32[10,32], index: 0, kind: input, shape index: {}]   ;;  %s277_s1 = inlined_call_operand.hbm [shape: f32[10,32], index: 1, kind: input, shape index: {}]   ;;  %s278_s2 = inlined_call_operand.hbm [shape: f32[1,1,32], index: 2, kind: output, shape index: {}]  }
   0x1   :  { %8 = vsyncpa [#allocation6], 0 }
   0x2   :  { %9 = vsyncpa [#allocation4], 0  ;;  %s214_s9 = smov [#allocation2]   ;;  %s142_s13 = scalar_lea.hbm %s276_s0, 256 }
   0x3   :  { %s15_s10 = sshll.u32 %s214_s9, 4  ;;  %p143_p0 = scmp.ne.s32.totalorder %s276_s0, %s142_s13  ;;  %s16_s10 = int_to_ptr.vmem [resolvable:$true] %s15_s10 }
   0x4   :  { %p146_p1 = scmp.lt.u32.totalorder %s142_s13, %s276_s0 }
   0x6   :  { %p148_p2 = pnand %p146_p1, %p143_p0 }
   0x8   :  { %151 = shalt.err (!%p148_p2)
}
   0x9   :  { %s152_s18 = scalar_lea.vmem %s16_s10, 256  ;;  %p157_p4 = scmp.lt.s32.totalorder %s16_s10, %s16_s10 }
   0xa   :  { %p153_p3 = scmp.ne.s32.totalorder %s16_s10, %s152_s18  ;;  %p158_p5 = scmp.lt.s32.totalorder %s152_s18, %s152_s18 }
   0xc   :  { %p159_p6 = por %p158_p5, %p157_p4 }
   0xe   :  { %p160_p7 = pnand %p159_p6, %p153_p3 }
  0x10   :  { %163 = shalt.err (!%p160_p7)
}
  0x11   :  { %s215_s19 = smov 128   ;;  %s216_s20 = smov 8  }
  0x12   :  { %21 = dma.hbm_to_vmem [thread:$0]  %s276_s0, 256, %s16_s10, [#allocation3], %s215_s19, %s215_s19, %s216_s20  }
  0x13   :  { %s217_s23 = smov [#allocation5]   ;;  %s164_s27 = scalar_lea.hbm %s277_s1, 256 }
  0x14   :  { %s27_s24 = sshll.u32 %s217_s23, 4  ;;  %p165_p8 = scmp.ne.s32.totalorder %s277_s1, %s164_s27  ;;  %s28_s24 = int_to_ptr.vmem [resolvable:$true] %s27_s24 }
  0x15   :  { %p168_p9 = scmp.lt.u32.totalorder %s164_s27, %s277_s1 }
  0x17   :  { %p170_p10 = pnand %p168_p9, %p165_p8 }
  0x19   :  { %173 = shalt.err (!%p170_p10)
}
  0x1a   :  { %s174_s4 = scalar_lea.vmem %s28_s24, 256  ;;  %p179_p12 = scmp.lt.s32.totalorder %s28_s24, %s28_s24 }
  0x1b   :  { %p175_p11 = scmp.ne.s32.totalorder %s28_s24, %s174_s4  ;;  %p180_p13 = scmp.lt.s32.totalorder %s174_s4, %s174_s4 }
  0x1d   :  { %p181_p0 = por %p180_p13, %p179_p12 }
  0x1f   :  { %p182_p1 = pnand %p181_p0, %p175_p11 }
  0x21   :  { %185 = shalt.err (!%p182_p1)
}
  0x22   :  { %33 = dma.hbm_to_vmem [thread:$0]  %s277_s1, 256, %s28_s24, [#allocation6], %s215_s19, %s215_s19, %s216_s20  }
  0x23   :  { %208 = dma.done.wait [#allocation3], 256  }
  0x24   :  { %209 = vsyncadd [#allocation3], 4294967040 }
  0x25   :  { %210 = dma.done.wait [#allocation6], 256  }
  0x26   :  { %211 = vsyncadd [#allocation6], 4294967040  ;;  %vm44_vm0 = vcmask 261120   ;;  %v41_v0 = vld [vmem:[#allocation2 + $0x8] sm:$0xff]  ;;  %v40_v1 = vld [vmem:[#allocation2] sm:$0xff]  ;;  %v83_v22 = vlaneseq  ;;  %s218_s1 = smov [#allocation7]  }
  0x27   :  { %v48_v2 = vsel %vm44_vm0, %v41_v0, -inf  ;;  %v45_v3 = vsel %vm44_vm0, %v40_v1, -inf  ;;  %v43_v23 = vld [vmem:[#allocation5 + $0x8] sm:$0xff]  ;;  %v42_v28 = vld [vmem:[#allocation5] sm:$0xff]  ;;  %s115_s6 = sshll.u32 %s218_s1, 4  ;;  %vm107_vm2 = vcmask 253952   ;;  %s116_s6 = int_to_ptr.vmem [resolvable:$true] %s115_s6 }
  0x28   :  { %49 = vmax.xlane.f32.xlu0 %v48_v2  ;;  %v84_v24 = vshrl.u32 %v83_v22, 7  ;;  %v74_v25 = vsub.f32 0.0, %v43_v23  ;;  %v73_v34 = vsub.f32 0.0, %v42_v28  ;;  %s186_s7 = scalar_lea.vmem %s116_s6, 16  ;;  %s190_s8 = scalar_lea.vmem %s116_s6, 32 }
  0x29   :  { %p187_p2 = scmp.ne.s32.totalorder %s116_s6, %s186_s7  ;;  %p191_p3 = scmp.lt.s32.totalorder %s116_s6, %s116_s6 }
  0x2a   :  { %v85_v30 = vadd.s32 8, %v84_v24  ;;  %p192_p4 = scmp.lt.s32.totalorder %s190_s8, %s186_s7 }
  0x2c   :  { %46 = vmax.xlane.f32.xlu0 %v45_v3  ;;  %vm91_vm1 = vcmp.lt.s32.totalorder %v85_v30, 10  ;;  %p193_p5 = por %p192_p4, %p191_p3 }
  0x2e   :  { %p194_p6 = pnand %p193_p5, %p187_p2 }
  0xb5   :  { %v50_v4 = vpop.xlane.xlu0 %49 }
  0xb6   :  { %v52_v5 = vsub.f32 %v41_v0, %v50_v4 }
  0xb8   :  { %v55_v6 = vmul.f32 1.442695, %v52_v5 }
  0xb9   :  { %v47_v7 = vpop.xlane.xlu0 %46 }
  0xba   :  { %130 = vpow2.f32 %v55_v6  ;;  %v51_v8 = vsub.f32 %v40_v1, %v47_v7 }
  0xbc   :  { %v53_v9 = vmul.f32 1.442695, %v51_v8 }
  0xbe   :  { %132 = vpow2.f32 %v53_v9 }
  0xc4   :  { %v131_v10 = vpop.eup %130 }
  0xc5   :  { %v60_v11 = vsel %vm44_vm0, %v131_v10, 0.0 }
  0xc6   :  { %61 = vadd.xlane.f32.xlu1 %v60_v11 }
  0xc8   :  { %v133_v12 = vpop.eup %132 }
  0xc9   :  { %v57_v13 = vsel %vm44_vm0, %v133_v12, 0.0 }
  0xca   :  { %58 = vadd.xlane.f32.xlu1 %v57_v13 }
 0x153   :  { %v62_v14 = vpop.xlane.xlu1 %61 }
 0x154   :  { %134 = vrcp.f32 %v62_v14 }
 0x157   :  { %v59_v15 = vpop.xlane.xlu1 %58 }
 0x158   :  { %136 = vrcp.f32 %v59_v15 }
 0x15e   :  { %v135_v16 = vpop.eup %134 }
 0x15f   :  { %v66_v17 = vmul.f32 %v135_v16, %v131_v10 }
 0x161   :  { %v68_v18 = vadd.f32 1e-06, %v66_v17  ;;  %v78_v26 = vsub.f32 1.0, %v66_v17 }
 0x162   :  { %v137_v19 = vpop.eup %136 }
 0x163   :  { %138 = vlog2.f32 %v68_v18  ;;  %v65_v20 = vmul.f32 %v137_v19, %v133_v12  ;;  %v80_v32 = vmul.f32 %v78_v26, %v78_v26 }
 0x165   :  { %v67_v21 = vadd.f32 1e-06, %v65_v20  ;;  %v77_v33 = vsub.f32 1.0, %v65_v20 }
 0x167   :  { %140 = vlog2.f32 %v67_v21  ;;  %v79_v38 = vmul.f32 %v77_v33, %v77_v33 }
 0x16d   :  { %v139_v27 = vpop.eup %138 }
 0x16e   :  { %v72_v29 = vmul.f32 0.6931472, %v139_v27 }
 0x170   :  { %v76_v31 = vmul.f32 %v74_v25, %v72_v29 }
 0x171   :  { %v141_v35 = vpop.eup %140 }
 0x172   :  { %v82_v36 = vmul.f32 %v80_v32, %v76_v31  ;;  %v70_v37 = vmul.f32 0.6931472, %v141_v35 }
 0x174   :  { %v75_v39 = vmul.f32 %v73_v34, %v70_v37  ;;  %v97_v40 = vsel %vm91_vm1, %v82_v36, 0.0 }
 0x175   :  { %v99_v43 = vsel %vm44_vm0, %v97_v40, 0.0 }
 0x176   :  { %v81_v41 = vmul.f32 %v79_v38, %v75_v39 }
 0x178   :  { %v98_v42 = vsel %vm44_vm0, %v81_v41, 0.0 }
 0x179   :  { %v100_v44 = vadd.f32 %v99_v43, %v98_v42 }
 0x17b   :  { %v101_v45 = vrot.slane %v100_v44, 4 }
 0x17d   :  { %v102_v46 = vadd.f32 %v101_v45, %v100_v44 }
 0x17f   :  { %v103_v47 = vrot.slane %v102_v46, 2 }
 0x181   :  { %v104_v48 = vadd.f32 %v103_v47, %v102_v46 }
 0x183   :  { %v105_v49 = vrot.slane %v104_v48, 1 }
 0x185   :  { %v106_v50 = vadd.f32 %v105_v49, %v104_v48 }
 0x187   :  { %108 = vst.msk [vmem:[#allocation7] sm:$0x1] %vm107_vm2, %v106_v50 }
 0x188   :  { %197 = shalt.err (!%p194_p6)
}
 0x189   :  { %s198_s11 = scalar_lea.hbm %s278_s2, 16 }
 0x18a   :  { %p199_p7 = scmp.ne.s32.totalorder %s278_s2, %s198_s11  ;;  %p202_p8 = scmp.lt.u32.totalorder %s198_s11, %s278_s2 }
 0x18c   :  { %p204_p9 = pnand %p202_p8, %p199_p7 }
 0x18e   :  { %207 = shalt.err (!%p204_p9)
}
 0x18f   :  { %118 = dma.vmem_to_hbm [thread:$0]  %s116_s6, 16, %s278_s2, [#allocation4]  }
 0x190   :  { %212 = dma.done.wait [#allocation4], 16  }
 0x191   :  { %213 = vsyncadd [#allocation4], 4294967280 }
 0x192   :  { %122 = vsyncpa [#allocation3], 1 }
 0x193   :  { %123 = vsyncpa [#allocation6], 1 }
 0x194   :  { %124 = vsyncpa [#allocation4], 1 }

</bundles_post_ra>
